<compile_context>
chip_gen: v7x
topology: tpu7x:2x2x1
jax: 0.10.0
libtpu: 0.0.40
codegen_flags: <defaults>
</compile_context>

<pallas_src>
import functools

import jax
import jax.numpy as jnp
from jax.experimental import pallas as pl
from jax.experimental.pallas import tpu as pltpu

IMAGENET_MEAN = (0.485, 0.456, 0.406)
IMAGENET_STD = (0.229, 0.224, 0.225)
BN_EPS = 1e-5


def _round_up(x, m):
    return ((x + m - 1) // m) * m


def _padded_tile_bytes(shape, itemsize):
    """VMEM footprint of one buffer holding `shape` (minor dims tile to (8,128))."""
    shape = tuple(int(d) for d in shape)
    if len(shape) == 1:
        shape = (1,) + shape
    lead = 1
    for d in shape[:-2]:
        lead *= d
    sub, lane = shape[-2], shape[-1]
    return lead * _round_up(sub, 8) * _round_up(lane, 128) * itemsize


def _vmem_limit_bytes():
    """Per-generation scoped-VMEM budget: half of physical VMEM (v5e/v6e: 64 MiB,
    v7x: 32 MiB), conservative 32 MiB when the query is unavailable."""
    cap = None
    try:
        info_fn = getattr(pltpu, "get_tpu_info", None)
        if info_fn is not None:
            cap = int(info_fn().vmem_capacity_bytes)
    except Exception:
        cap = None
    if not cap:
        cap = 64 << 20
    return max(16 << 20, min(cap // 2, 64 << 20))


def _choose_chunk(hwp, max_lanes):
    """Largest multiple-of-128 divisor of hwp (itself a 128 multiple) <= max_lanes."""
    max_lanes = max(128, (int(max_lanes) // 128) * 128)
    if hwp <= max_lanes:
        return hwp
    c = max_lanes
    while c >= 128:
        if hwp % c == 0:
            return c
        c -= 128
    return 128


# -----------------------------------------------------------------------------
# Fused SysNet kernel: encoders + repeat + decoder MLP in one pallas_call.
# Grid axis 0 = spatial chunks of H*W ("arbitrary" reduction for the GAP).
# -----------------------------------------------------------------------------
def _sysnet_kernel(
    # inputs
    fg_img_ref, bg_img_ref, noise_ref,
    fg_w_ref, fg_b_ref, bg_w_ref, bg_b_ref,
    w1fg_ref, w1bg_ref, w1nz_ref, b1_ref, g1_ref, be1_ref,
    w2_ref, b2_ref, g2_ref, be2_ref,
    w3t_ref, b3_ref,
    # outputs
    fgf_ref, bgf_ref, loc_ref,
    # scratch (persist across the spatial-chunk grid)
    fg_acc, bg_acc, h_scr,
    *, batch, samp_N, inv_hw):
    s = pl.program_id(0)

    @pl.when(s == 0)
    def _init():
        fg_acc[...] = jnp.zeros_like(fg_acc)
        bg_acc[...] = jnp.zeros_like(bg_acc)

    # Streaming GAP accumulation (DMA-bound phase): the (B*3, chunk) blocks are
    # sublane-dense; casting to f32 in VMEM means bf16/u8 inputs only pay the
    # DMA of their own width.
    fg_acc[...] += jnp.sum(fg_img_ref[...].astype(jnp.float32), axis=-1,
                           keepdims=True)
    bg_acc[...] += jnp.sum(bg_img_ref[...].astype(jnp.float32), axis=-1,
                           keepdims=True)

    @pl.when(s == pl.num_programs(0) - 1)
    def _finalize():
        d_emb = fgf_ref.shape[1]
        d_fc = h_scr.shape[1]

        fg_g = fg_acc[...] * inv_hw                      # (B*3, 1) per-channel GAP
        bg_g = bg_acc[...] * inv_hw

        # Encoder linear (Normalize folded in the wrapper); K=3 => VPU FMAs.
        def encode_row(g_all, w_ref, b_ref, b):
            g = g_all[3 * b:3 * b + 3, 0:1]              # (3, 1) static slice
            return (g[0:1, :] * w_ref[0:1, :]
                    + g[1:2, :] * w_ref[1:2, :]
                    + g[2:3, :] * w_ref[2:3, :]) + b_ref[...]   # (1, d_emb)

        # Per-sample epilogue on the un-repeated rows; repeats are written as
        # sublane-broadcast stores (repeat_interleave ordering, matching
        # torch unsqueeze(1).repeat(1, samp_N, 1).view(-1, d)).
        for b in range(batch):                           # static, small batch
            fg_row = encode_row(fg_g, fg_w_ref, fg_b_ref, b)
            bg_row = encode_row(bg_g, bg_w_ref, bg_b_ref, b)
            lo, hi = b * samp_N, (b + 1) * samp_N
            fgf_ref[lo:hi, :] = jnp.broadcast_to(fg_row, (samp_N, d_emb))
            bgf_ref[lo:hi, :] = jnp.broadcast_to(bg_row, (samp_N, d_emb))
            hb = (jnp.dot(fg_row, w1fg_ref[...], preferred_element_type=jnp.float32)
                  + jnp.dot(bg_row, w1bg_ref[...], preferred_element_type=jnp.float32)
                  + b1_ref[...])                         # (1, d_fc)
            h_scr[lo:hi, :] = jnp.broadcast_to(hb, (samp_N, d_fc))

        # Noise contribution (K=3 => VPU FMAs); dec_in never materializes.
        nz = noise_ref[...]                              # (N, 3)
        h = h_scr[...] + (nz[:, 0:1] * w1nz_ref[0:1, :]
                          + nz[:, 1:2] * w1nz_ref[1:2, :]
                          + nz[:, 2:3] * w1nz_ref[2:3, :])      # (N, d_fc)

        def bn_relu(hh, g_ref, be_ref):
            # Training-mode BatchNorm1d: batch mean + biased variance, two-pass
            # for numerical stability.
            # TODO(synk): eval-mode running statistics are not modeled (the
            # module state here has none); is_train=False still uses batch stats.
            mu = jnp.mean(hh, axis=0, keepdims=True)
            d = hh - mu
            var = jnp.mean(d * d, axis=0, keepdims=True)
            hn = d * jax.lax.rsqrt(var + BN_EPS) * g_ref[...] + be_ref[...]
            return jnp.maximum(hn, 0.0)

        h = bn_relu(h, g1_ref, be1_ref)
        h = jnp.dot(h, w2_ref[...], preferred_element_type=jnp.float32) + b2_ref[...]
        h = bn_relu(h, g2_ref, be2_ref)

        # Final d_fc -> 3 projection: three lane reductions; write the output
        # columns directly (no lane concatenate). Exact sigmoid.
        for j in range(3):
            oj = (jnp.sum(h * w3t_ref[j:j + 1, :], axis=-1, keepdims=True)
                  + b3_ref[0:1, j:j + 1])                # (N, 1)
            loc_ref[:, j:j + 1] = 1.0 / (1.0 + jnp.exp(-oj))


# -----------------------------------------------------------------------------
# Parameter init (deterministic, mirrors weights_init_normal semantics)
# -----------------------------------------------------------------------------
def init_params(key, d_emb, d_fc_gen):
    ks = jax.random.split(key, 8)
    d_in = 2 * d_emb + 3
    return {
        # encoders (synthetic stand-in for the missing Encoder backbone)
        "fg_w": 0.02 * jax.random.normal(ks[0], (3, d_emb), jnp.float32),
        "fg_b": jnp.zeros((d_emb,), jnp.float32),
        "bg_w": 0.02 * jax.random.normal(ks[1], (3, d_emb), jnp.float32),
        "bg_b": jnp.zeros((d_emb,), jnp.float32),
        # decoder: Linear weights N(0, 0.02), biases 0; BN gamma N(1, 0.02), beta 0
        "w1": 0.02 * jax.random.normal(ks[2], (d_in, d_fc_gen), jnp.float32),
        "b1": jnp.zeros((d_fc_gen,), jnp.float32),
        "g1": 1.0 + 0.02 * jax.random.normal(ks[3], (d_fc_gen,), jnp.float32),
        "be1": jnp.zeros((d_fc_gen,), jnp.float32),
        "w2": 0.02 * jax.random.normal(ks[4], (d_fc_gen, d_fc_gen), jnp.float32),
        "b2": jnp.zeros((d_fc_gen,), jnp.float32),
        "g2": 1.0 + 0.02 * jax.random.normal(ks[5], (d_fc_gen,), jnp.float32),
        "be2": jnp.zeros((d_fc_gen,), jnp.float32),
        "w3": 0.02 * jax.random.normal(ks[6], (d_fc_gen, 3), jnp.float32),
        "b3": jnp.zeros((3,), jnp.float32),
    }


# -----------------------------------------------------------------------------
# SysNet.forward
# -----------------------------------------------------------------------------
def sysnet_forward(bg_img, fg_img, params, noise_key, samp_N, is_train=True):
    if not is_train:
        samp_N = 1
    B, C, H, W = bg_img.shape
    assert C == 3 and fg_img.shape == bg_img.shape
    HW = H * W
    N = B * samp_N
    d_emb = params["fg_w"].shape[1]
    d_fc = params["w1"].shape[1]

    # torch.randn((batch*samp_N, 3)) equivalent (different RNG stream).
    # TODO(synk): could be generated in-kernel with pltpu.prng_* (Box-Muller);
    # kept as a jax.random op for a well-defined deterministic N(0,1) stream.
    noises = jax.random.normal(noise_key, (N, 3), dtype=jnp.float32)

    # Fold Normalize() into the encoder linear (wrapper-side, tiny).
    mean = jnp.asarray(IMAGENET_MEAN, jnp.float32)
    std = jnp.asarray(IMAGENET_STD, jnp.float32)

    def fold(w, b):
        return w / std[:, None], (b - (mean / std) @ w).reshape(1, -1)

    fg_w, fg_b = fold(params["fg_w"], params["fg_b"])
    bg_w, bg_b = fold(params["bg_w"], params["bg_b"])

    # Split W1 row-wise to match cat((fg_feats, noises, bg_feats), dim=1).
    w1 = params["w1"]
    w1_fg, w1_nz, w1_bg = w1[:d_emb], w1[d_emb:d_emb + 3], w1[d_emb + 3:]
    w3t = params["w3"].T                                   # (3, d_fc)

    # Dense streaming layout: (B*3, HW) is a free (metadata-only) reshape.
    B3 = B * 3
    fg2 = fg_img.reshape(B3, HW)
    bg2 = bg_img.reshape(B3, HW)
    HWp = _round_up(HW, 128)
    if HWp != HW:
        # Zero pad: zeros add 0 to the GAP sum (mean still divides by true HW).
        # Costs one copy, only for non-128-aligned spatial sizes.
        fg2 = jnp.pad(fg2, ((0, 0), (0, HWp - HW)))
        bg2 = jnp.pad(bg2, ((0, 0), (0, HWp - HW)))

    def r2(x):
        return x.reshape(1, -1)

    small_args = (
        noises, fg_w, fg_b, bg_w, bg_b,
        w1_fg, w1_bg, w1_nz,
        r2(params["b1"]), r2(params["g1"]), r2(params["be1"]),
        params["w2"], r2(params["b2"]), r2(params["g2"]), r2(params["be2"]),
        w3t, r2(params["b3"]),
    )
    out_shapes = (
        jax.ShapeDtypeStruct((N, d_emb), jnp.float32),   # fg_feats (repeated)
        jax.ShapeDtypeStruct((N, d_emb), jnp.float32),   # bg_feats (repeated)
        jax.ShapeDtypeStruct((N, 3), jnp.float32),       # locations
    )
    scratch_shapes = [
        pltpu.VMEM((B3, 1), jnp.float32),                # fg GAP accumulator
        pltpu.VMEM((B3, 1), jnp.float32),                # bg GAP accumulator
        pltpu.VMEM((N, d_fc), jnp.float32),              # repeated h_base
    ]

    # ---- VMEM budget -> spatial chunk (per chip generation) -----------------
    vmem_limit = _vmem_limit_bytes()
    resident = 0
    for a in small_args:                                  # double-buffered by Pallas
        resident += 2 * _padded_tile_bytes(a.shape, jnp.dtype(a.dtype).itemsize)
    for o in out_shapes:
        resident += 2 * _padded_tile_bytes(o.shape, 4)
    resident += 2 * _padded_tile_bytes((B3, 1), 4)        # accumulators (scratch)
    resident += _padded_tile_bytes((N, d_fc), 4)          # h scratch
    rows_pad = _round_up(B3, 8)
    img_itemsize = jnp.dtype(bg_img.dtype).itemsize
    # Per lane of chunk: 2 images x 2 pipeline buffers in the input dtype, plus
    # one conservative f32 cast temp per image.
    per_lane = rows_pad * (2 * 2 * img_itemsize + 2 * 4)
    headroom = 2 << 20
    budget = vmem_limit - resident - headroom
    max_lanes = (budget // per_lane) if budget > 0 else 128
    max_lanes = min(int(max_lanes), 128 * 1024)           # cap single-step DMA
    chunk = _choose_chunk(HWp, max_lanes)
    n_chunks = HWp // chunk

    img_spec = pl.BlockSpec((B3, chunk), lambda s: (0, s))
    in_specs = [img_spec, img_spec] + [
        pl.BlockSpec(a.shape, lambda s: (0, 0)) for a in small_args
    ]
    out_specs = [
        pl.BlockSpec((N, d_emb), lambda s: (0, 0)),
        pl.BlockSpec((N, d_emb), lambda s: (0, 0)),
        pl.BlockSpec((N, 3), lambda s: (0, 0)),
    ]

    kernel = functools.partial(_sysnet_kernel, batch=B, samp_N=samp_N,
                               inv_hw=1.0 / HW)

    fg_feats, bg_feats, locations = pl.pallas_call(
        kernel,
        out_shape=out_shapes,
        grid_spec=pltpu.PrefetchScalarGridSpec(
            num_scalar_prefetch=0,
            grid=(n_chunks,),
            in_specs=in_specs,
            out_specs=out_specs,
            scratch_shapes=scratch_shapes,
        ),
        compiler_params=pltpu.CompilerParams(
            dimension_semantics=("arbitrary",),
            vmem_limit_bytes=int(vmem_limit),
        ),
    )(fg2, bg2, *small_args)

    return noises, locations, fg_feats, bg_feats


if __name__ == "__main__":
    # small shapes consistent with the module
    batch, C, H, W = 2, 3, 16, 16
    d_emb, d_fc_gen, samp_N = 32, 64, 4

    root = jax.random.PRNGKey(0)
    k_bg, k_fg, k_par, k_noise = jax.random.split(root, 4)

    bg_img = jax.random.uniform(k_bg, (batch, C, H, W), jnp.float32)
    fg_img = jax.random.uniform(k_fg, (batch, C, H, W), jnp.float32)
    params = init_params(k_par, d_emb, d_fc_gen)

    fwd = jax.jit(sysnet_forward, static_argnames=("samp_N", "is_train"))
    noises, locations, fg_feats, bg_feats = fwd(
        bg_img, fg_img, params, k_noise, samp_N=samp_N, is_train=True)
    jax.block_until_ready((noises, locations, fg_feats, bg_feats))

    assert noises.shape == (batch * samp_N, 3)
    assert locations.shape == (batch * samp_N, 3)
    assert fg_feats.shape == (batch * samp_N, d_emb)
    assert bg_feats.shape == (batch * samp_N, d_emb)
    assert bool(jnp.all(jnp.isfinite(locations)))
    assert bool(jnp.all((locations >= 0.0) & (locations <= 1.0)))
    # repeated-row structure: rows b*samp_N .. (b+1)*samp_N-1 are identical
    assert bool(jnp.allclose(fg_feats[0], fg_feats[samp_N - 1]))
    assert bool(jnp.allclose(bg_feats[samp_N], bg_feats[2 * samp_N - 1]))

    print("KERNEL_OK")
</pallas_src>

<mosaic_0001>
module attributes {stable_mosaic.version = 11 : i64} {
  func.func @_sysnet_kernel(%arg0: i32, %arg1: memref<6x256xf32, #tpu.memory_space<vmem>>, %arg2: memref<6x256xf32, #tpu.memory_space<vmem>>, %arg3: memref<8x3xf32, #tpu.memory_space<vmem>>, %arg4: memref<3x32xf32, #tpu.memory_space<vmem>>, %arg5: memref<1x32xf32, #tpu.memory_space<vmem>>, %arg6: memref<3x32xf32, #tpu.memory_space<vmem>>, %arg7: memref<1x32xf32, #tpu.memory_space<vmem>>, %arg8: memref<32x64xf32, #tpu.memory_space<vmem>>, %arg9: memref<32x64xf32, #tpu.memory_space<vmem>>, %arg10: memref<3x64xf32, #tpu.memory_space<vmem>>, %arg11: memref<1x64xf32, #tpu.memory_space<vmem>>, %arg12: memref<1x64xf32, #tpu.memory_space<vmem>>, %arg13: memref<1x64xf32, #tpu.memory_space<vmem>>, %arg14: memref<64x64xf32, #tpu.memory_space<vmem>>, %arg15: memref<1x64xf32, #tpu.memory_space<vmem>>, %arg16: memref<1x64xf32, #tpu.memory_space<vmem>>, %arg17: memref<1x64xf32, #tpu.memory_space<vmem>>, %arg18: memref<3x64xf32, #tpu.memory_space<vmem>>, %arg19: memref<1x3xf32, #tpu.memory_space<vmem>>, %arg20: memref<8x32xf32, #tpu.memory_space<vmem>>, %arg21: memref<8x32xf32, #tpu.memory_space<vmem>>, %arg22: memref<8x3xf32, #tpu.memory_space<vmem>>, %arg23: memref<6x1xf32, #tpu.memory_space<vmem>>, %arg24: memref<6x1xf32, #tpu.memory_space<vmem>>, %arg25: memref<8x64xf32, #tpu.memory_space<vmem>>) attributes {dimension_semantics = [#tpu.dimension_semantics<arbitrary>], iteration_bounds = array<i64: 1>, scalar_prefetch = 0 : i64, scratch_operands = 3 : i64, tpu.core_type = #tpu.core_type<tc>, window_params = [{transform_indices = @transform_0, window_bounds = array<i64: 6, 256>}, {transform_indices = @transform_1, window_bounds = array<i64: 6, 256>}, {pipeline_mode = #tpu.pipeline_mode<synchronous>, transform_indices = @transform_2, window_bounds = array<i64: 8, 3>}, {pipeline_mode = #tpu.pipeline_mode<synchronous>, transform_indices = @transform_3, window_bounds = array<i64: 3, 32>}, {pipeline_mode = #tpu.pipeline_mode<synchronous>, transform_indices = @transform_4, window_bounds = array<i64: 1, 32>}, {pipeline_mode = #tpu.pipeline_mode<synchronous>, transform_indices = @transform_5, window_bounds = array<i64: 3, 32>}, {pipeline_mode = #tpu.pipeline_mode<synchronous>, transform_indices = @transform_6, window_bounds = array<i64: 1, 32>}, {pipeline_mode = #tpu.pipeline_mode<synchronous>, transform_indices = @transform_7, window_bounds = array<i64: 32, 64>}, {pipeline_mode = #tpu.pipeline_mode<synchronous>, transform_indices = @transform_8, window_bounds = array<i64: 32, 64>}, {pipeline_mode = #tpu.pipeline_mode<synchronous>, transform_indices = @transform_9, window_bounds = array<i64: 3, 64>}, {pipeline_mode = #tpu.pipeline_mode<synchronous>, transform_indices = @transform_10, window_bounds = array<i64: 1, 64>}, {pipeline_mode = #tpu.pipeline_mode<synchronous>, transform_indices = @transform_11, window_bounds = array<i64: 1, 64>}, {pipeline_mode = #tpu.pipeline_mode<synchronous>, transform_indices = @transform_12, window_bounds = array<i64: 1, 64>}, {pipeline_mode = #tpu.pipeline_mode<synchronous>, transform_indices = @transform_13, window_bounds = array<i64: 64, 64>}, {pipeline_mode = #tpu.pipeline_mode<synchronous>, transform_indices = @transform_14, window_bounds = array<i64: 1, 64>}, {pipeline_mode = #tpu.pipeline_mode<synchronous>, transform_indices = @transform_15, window_bounds = array<i64: 1, 64>}, {pipeline_mode = #tpu.pipeline_mode<synchronous>, transform_indices = @transform_16, window_bounds = array<i64: 1, 64>}, {pipeline_mode = #tpu.pipeline_mode<synchronous>, transform_indices = @transform_17, window_bounds = array<i64: 3, 64>}, {pipeline_mode = #tpu.pipeline_mode<synchronous>, transform_indices = @transform_18, window_bounds = array<i64: 1, 3>}, {pipeline_mode = #tpu.pipeline_mode<synchronous>, transform_indices = @transform_19, window_bounds = array<i64: 8, 32>}, {pipeline_mode = #tpu.pipeline_mode<synchronous>, transform_indices = @transform_20, window_bounds = array<i64: 8, 32>}, {pipeline_mode = #tpu.pipeline_mode<synchronous>, transform_indices = @transform_21, window_bounds = array<i64: 8, 3>}]} {
    %c0_i32 = arith.constant 0 : i32
    %0 = arith.cmpi eq, %arg0, %c0_i32 : i32
    %1 = arith.extui %0 : i1 to i32
    %c0_i32_0 = arith.constant 0 : i32
    %2 = arith.cmpi ne, %1, %c0_i32_0 : i32
    scf.if %2 {
      %cst_15 = arith.constant 0.000000e+00 : f32
      %18 = vector.broadcast %cst_15 : f32 to vector<6x1xf32>
      %c0_16 = arith.constant 0 : index
      %c0_17 = arith.constant 0 : index
      %19 = vector.load %arg23[%c0_16, %c0_17] : memref<6x1xf32, #tpu.memory_space<vmem>>, vector<6x1xf32>
      tpu.vector_store %arg23[%c0_16, %c0_17], %18 {strides = array<i32>} : memref<6x1xf32, #tpu.memory_space<vmem>>, vector<6x1xf32>,
      %cst_18 = arith.constant 0.000000e+00 : f32
      %20 = vector.broadcast %cst_18 : f32 to vector<6x1xf32>
      %c0_19 = arith.constant 0 : index
      %c0_20 = arith.constant 0 : index
      %21 = vector.load %arg24[%c0_19, %c0_20] : memref<6x1xf32, #tpu.memory_space<vmem>>, vector<6x1xf32>
      tpu.vector_store %arg24[%c0_19, %c0_20], %20 {strides = array<i32>} : memref<6x1xf32, #tpu.memory_space<vmem>>, vector<6x1xf32>,
    } else {
    }
    %c0 = arith.constant 0 : index
    %c0_1 = arith.constant 0 : index
    %3 = vector.load %arg23[%c0, %c0_1] : memref<6x1xf32, #tpu.memory_space<vmem>>, vector<6x1xf32>
    %c0_2 = arith.constant 0 : index
    %c0_3 = arith.constant 0 : index
    %4 = vector.load %arg1[%c0_2, %c0_3] : memref<6x256xf32, #tpu.memory_space<vmem>>, vector<6x256xf32>
    %cst = arith.constant dense<0.000000e+00> : vector<6xf32>
    %5 = vector.multi_reduction <add>, %4, %cst [1] : vector<6x256xf32> to vector<6xf32>
    %6 = vector.shape_cast %5 : vector<6xf32> to vector<6x1xf32>
    %7 = arith.addf %3, %6 : vector<6x1xf32>
    %c0_4 = arith.constant 0 : index
    %c0_5 = arith.constant 0 : index
    %8 = vector.load %arg23[%c0_4, %c0_5] : memref<6x1xf32, #tpu.memory_space<vmem>>, vector<6x1xf32>
    tpu.vector_store %arg23[%c0_4, %c0_5], %7 {strides = array<i32>} : memref<6x1xf32, #tpu.memory_space<vmem>>, vector<6x1xf32>,
    %c0_6 = arith.constant 0 : index
    %c0_7 = arith.constant 0 : index
    %9 = vector.load %arg24[%c0_6, %c0_7] : memref<6x1xf32, #tpu.memory_space<vmem>>, vector<6x1xf32>
    %c0_8 = arith.constant 0 : index
    %c0_9 = arith.constant 0 : index
    %10 = vector.load %arg2[%c0_8, %c0_9] : memref<6x256xf32, #tpu.memory_space<vmem>>, vector<6x256xf32>
    %cst_10 = arith.constant dense<0.000000e+00> : vector<6xf32>
    %11 = vector.multi_reduction <add>, %10, %cst_10 [1] : vector<6x256xf32> to vector<6xf32>
    %12 = vector.shape_cast %11 : vector<6xf32> to vector<6x1xf32>
    %13 = arith.addf %9, %12 : vector<6x1xf32>
    %c0_11 = arith.constant 0 : index
    %c0_12 = arith.constant 0 : index
    %14 = vector.load %arg24[%c0_11, %c0_12] : memref<6x1xf32, #tpu.memory_space<vmem>>, vector<6x1xf32>
    tpu.vector_store %arg24[%c0_11, %c0_12], %13 {strides = array<i32>} : memref<6x1xf32, #tpu.memory_space<vmem>>, vector<6x1xf32>,
    %c0_i32_13 = arith.constant 0 : i32
    %15 = arith.cmpi eq, %arg0, %c0_i32_13 : i32
    %16 = arith.extui %15 : i1 to i32
    %c0_i32_14 = arith.constant 0 : i32
    %17 = arith.cmpi ne, %16, %c0_i32_14 : i32
    scf.if %17 {
      %c0_15 = arith.constant 0 : index
      %c0_16 = arith.constant 0 : index
      %18 = vector.load %arg23[%c0_15, %c0_16] : memref<6x1xf32, #tpu.memory_space<vmem>>, vector<6x1xf32>
      %cst_17 = arith.constant 3.906250e-03 : f32
      %19 = vector.broadcast %cst_17 : f32 to vector<6x1xf32>
      %20 = arith.mulf %18, %19 : vector<6x1xf32>
      %c0_18 = arith.constant 0 : index
      %c0_19 = arith.constant 0 : index
      %21 = vector.load %arg24[%c0_18, %c0_19] : memref<6x1xf32, #tpu.memory_space<vmem>>, vector<6x1xf32>
      %cst_20 = arith.constant 3.906250e-03 : f32
      %22 = vector.broadcast %cst_20 : f32 to vector<6x1xf32>
      %23 = arith.mulf %21, %22 : vector<6x1xf32>
      %24 = vector.extract_strided_slice %20 {offsets = [0, 0], sizes = [3, 1], strides = [1, 1]} : vector<6x1xf32> to vector<3x1xf32>
      %25 = vector.extract_strided_slice %24 {offsets = [0, 0], sizes = [1, 1], strides = [1, 1]} : vector<3x1xf32> to vector<1x1xf32>
      %c0_21 = arith.constant 0 : index
      %c0_22 = arith.constant 0 : index
      %26 = vector.load %arg4[%c0_21, %c0_22] : memref<3x32xf32, #tpu.memory_space<vmem>>, vector<1x32xf32>
      %27 = vector.broadcast %25 : vector<1x1xf32> to vector<1x32xf32>
      %28 = arith.mulf %27, %26 : vector<1x32xf32>
      %29 = vector.extract_strided_slice %24 {offsets = [1, 0], sizes = [1, 1], strides = [1, 1]} : vector<3x1xf32> to vector<1x1xf32>
      %c1 = arith.constant 1 : index
      %c0_23 = arith.constant 0 : index
      %30 = vector.load %arg4[%c1, %c0_23] : memref<3x32xf32, #tpu.memory_space<vmem>>, vector<1x32xf32>
      %31 = vector.broadcast %29 : vector<1x1xf32> to vector<1x32xf32>
      %32 = arith.mulf %31, %30 : vector<1x32xf32>
      %33 = arith.addf %28, %32 : vector<1x32xf32>
      %34 = vector.extract_strided_slice %24 {offsets = [2, 0], sizes = [1, 1], strides = [1, 1]} : vector<3x1xf32> to vector<1x1xf32>
      %c2 = arith.constant 2 : index
      %c0_24 = arith.constant 0 : index
      %35 = vector.load %arg4[%c2, %c0_24] : memref<3x32xf32, #tpu.memory_space<vmem>>, vector<1x32xf32>
      %36 = vector.broadcast %34 : vector<1x1xf32> to vector<1x32xf32>
      %37 = arith.mulf %36, %35 : vector<1x32xf32>
      %38 = arith.addf %33, %37 : vector<1x32xf32>
      %c0_25 = arith.constant 0 : index
      %c0_26 = arith.constant 0 : index
      %39 = vector.load %arg5[%c0_25, %c0_26] : memref<1x32xf32, #tpu.memory_space<vmem>>, vector<1x32xf32>
      %40 = arith.addf %38, %39 : vector<1x32xf32>
      %41 = vector.extract_strided_slice %23 {offsets = [0, 0], sizes = [3, 1], strides = [1, 1]} : vector<6x1xf32> to vector<3x1xf32>
      %42 = vector.extract_strided_slice %41 {offsets = [0, 0], sizes = [1, 1], strides = [1, 1]} : vector<3x1xf32> to vector<1x1xf32>
      %c0_27 = arith.constant 0 : index
      %c0_28 = arith.constant 0 : index
      %43 = vector.load %arg6[%c0_27, %c0_28] : memref<3x32xf32, #tpu.memory_space<vmem>>, vector<1x32xf32>
      %44 = vector.broadcast %42 : vector<1x1xf32> to vector<1x32xf32>
      %45 = arith.mulf %44, %43 : vector<1x32xf32>
      %46 = vector.extract_strided_slice %41 {offsets = [1, 0], sizes = [1, 1], strides = [1, 1]} : vector<3x1xf32> to vector<1x1xf32>
      %c1_29 = arith.constant 1 : index
      %c0_30 = arith.constant 0 : index
      %47 = vector.load %arg6[%c1_29, %c0_30] : memref<3x32xf32, #tpu.memory_space<vmem>>, vector<1x32xf32>
      %48 = vector.broadcast %46 : vector<1x1xf32> to vector<1x32xf32>
      %49 = arith.mulf %48, %47 : vector<1x32xf32>
      %50 = arith.addf %45, %49 : vector<1x32xf32>
      %51 = vector.extract_strided_slice %41 {offsets = [2, 0], sizes = [1, 1], strides = [1, 1]} : vector<3x1xf32> to vector<1x1xf32>
      %c2_31 = arith.constant 2 : index
      %c0_32 = arith.constant 0 : index
      %52 = vector.load %arg6[%c2_31, %c0_32] : memref<3x32xf32, #tpu.memory_space<vmem>>, vector<1x32xf32>
      %53 = vector.broadcast %51 : vector<1x1xf32> to vector<1x32xf32>
      %54 = arith.mulf %53, %52 : vector<1x32xf32>
      %55 = arith.addf %50, %54 : vector<1x32xf32>
      %c0_33 = arith.constant 0 : index
      %c0_34 = arith.constant 0 : index
      %56 = vector.load %arg7[%c0_33, %c0_34] : memref<1x32xf32, #tpu.memory_space<vmem>>, vector<1x32xf32>
      %57 = arith.addf %55, %56 : vector<1x32xf32>
      %58 = vector.shape_cast %40 : vector<1x32xf32> to vector<1x32xf32>
      %59 = vector.broadcast %58 : vector<1x32xf32> to vector<4x32xf32>
      %c0_35 = arith.constant 0 : index
      %c0_36 = arith.constant 0 : index
      %60 = vector.load %arg20[%c0_35, %c0_36] : memref<8x32xf32, #tpu.memory_space<vmem>>, vector<4x32xf32>
      tpu.vector_store %arg20[%c0_35, %c0_36], %59 {strides = array<i32>} : memref<8x32xf32, #tpu.memory_space<vmem>>, vector<4x32xf32>,
      %61 = vector.shape_cast %57 : vector<1x32xf32> to vector<1x32xf32>
      %62 = vector.broadcast %61 : vector<1x32xf32> to vector<4x32xf32>
      %c0_37 = arith.constant 0 : index
      %c0_38 = arith.constant 0 : index
      %63 = vector.load %arg21[%c0_37, %c0_38] : memref<8x32xf32, #tpu.memory_space<vmem>>, vector<4x32xf32>
      tpu.vector_store %arg21[%c0_37, %c0_38], %62 {strides = array<i32>} : memref<8x32xf32, #tpu.memory_space<vmem>>, vector<4x32xf32>,
      %c0_39 = arith.constant 0 : index
      %c0_40 = arith.constant 0 : index
      %64 = vector.load %arg8[%c0_39, %c0_40] : memref<32x64xf32, #tpu.memory_space<vmem>>, vector<32x64xf32>
      %cst_41 = arith.constant dense<0.000000e+00> : vector<1x64xf32>
      %65 = tpu.matmul %40, %64, %cst_41 {dimension_numbers = #tpu.dot_dimension_numbers<[1], [0], [0], [1], [0, 0, 1, 1], [], []>} : vector<1x32xf32>, vector<32x64xf32>, vector<1x64xf32> -> vector<1x64xf32>
      %c0_42 = arith.constant 0 : index
      %c0_43 = arith.constant 0 : index
      %66 = vector.load %arg9[%c0_42, %c0_43] : memref<32x64xf32, #tpu.memory_space<vmem>>, vector<32x64xf32>
      %cst_44 = arith.constant dense<0.000000e+00> : vector<1x64xf32>
      %67 = tpu.matmul %57, %66, %cst_44 {dimension_numbers = #tpu.dot_dimension_numbers<[1], [0], [0], [1], [0, 0, 1, 1], [], []>} : vector<1x32xf32>, vector<32x64xf32>, vector<1x64xf32> -> vector<1x64xf32>
      %68 = arith.addf %65, %67 : vector<1x64xf32>
      %c0_45 = arith.constant 0 : index
      %c0_46 = arith.constant 0 : index
      %69 = vector.load %arg11[%c0_45, %c0_46] : memref<1x64xf32, #tpu.memory_space<vmem>>, vector<1x64xf32>
      %70 = arith.addf %68, %69 : vector<1x64xf32>
      %71 = vector.shape_cast %70 : vector<1x64xf32> to vector<1x64xf32>
      %72 = vector.broadcast %71 : vector<1x64xf32> to vector<4x64xf32>
      %c0_47 = arith.constant 0 : index
      %c0_48 = arith.constant 0 : index
      %73 = vector.load %arg25[%c0_47, %c0_48] : memref<8x64xf32, #tpu.memory_space<vmem>>, vector<4x64xf32>
      tpu.vector_store %arg25[%c0_47, %c0_48], %72 {strides = array<i32>} : memref<8x64xf32, #tpu.memory_space<vmem>>, vector<4x64xf32>,
      %74 = vector.extract_strided_slice %20 {offsets = [3, 0], sizes = [3, 1], strides = [1, 1]} : vector<6x1xf32> to vector<3x1xf32>
      %75 = vector.extract_strided_slice %74 {offsets = [0, 0], sizes = [1, 1], strides = [1, 1]} : vector<3x1xf32> to vector<1x1xf32>
      %c0_49 = arith.constant 0 : index
      %c0_50 = arith.constant 0 : index
      %76 = vector.load %arg4[%c0_49, %c0_50] : memref<3x32xf32, #tpu.memory_space<vmem>>, vector<1x32xf32>
      %77 = vector.broadcast %75 : vector<1x1xf32> to vector<1x32xf32>
      %78 = arith.mulf %77, %76 : vector<1x32xf32>
      %79 = vector.extract_strided_slice %74 {offsets = [1, 0], sizes = [1, 1], strides = [1, 1]} : vector<3x1xf32> to vector<1x1xf32>
      %c1_51 = arith.constant 1 : index
      %c0_52 = arith.constant 0 : index
      %80 = vector.load %arg4[%c1_51, %c0_52] : memref<3x32xf32, #tpu.memory_space<vmem>>, vector<1x32xf32>
      %81 = vector.broadcast %79 : vector<1x1xf32> to vector<1x32xf32>
      %82 = arith.mulf %81, %80 : vector<1x32xf32>
      %83 = arith.addf %78, %82 : vector<1x32xf32>
      %84 = vector.extract_strided_slice %74 {offsets = [2, 0], sizes = [1, 1], strides = [1, 1]} : vector<3x1xf32> to vector<1x1xf32>
      %c2_53 = arith.constant 2 : index
      %c0_54 = arith.constant 0 : index
      %85 = vector.load %arg4[%c2_53, %c0_54] : memref<3x32xf32, #tpu.memory_space<vmem>>, vector<1x32xf32>
      %86 = vector.broadcast %84 : vector<1x1xf32> to vector<1x32xf32>
      %87 = arith.mulf %86, %85 : vector<1x32xf32>
      %88 = arith.addf %83, %87 : vector<1x32xf32>
      %c0_55 = arith.constant 0 : index
      %c0_56 = arith.constant 0 : index
      %89 = vector.load %arg5[%c0_55, %c0_56] : memref<1x32xf32, #tpu.memory_space<vmem>>, vector<1x32xf32>
      %90 = arith.addf %88, %89 : vector<1x32xf32>
      %91 = vector.extract_strided_slice %23 {offsets = [3, 0], sizes = [3, 1], strides = [1, 1]} : vector<6x1xf32> to vector<3x1xf32>
      %92 = vector.extract_strided_slice %91 {offsets = [0, 0], sizes = [1, 1], strides = [1, 1]} : vector<3x1xf32> to vector<1x1xf32>
      %c0_57 = arith.constant 0 : index
      %c0_58 = arith.constant 0 : index
      %93 = vector.load %arg6[%c0_57, %c0_58] : memref<3x32xf32, #tpu.memory_space<vmem>>, vector<1x32xf32>
      %94 = vector.broadcast %92 : vector<1x1xf32> to vector<1x32xf32>
      %95 = arith.mulf %94, %93 : vector<1x32xf32>
      %96 = vector.extract_strided_slice %91 {offsets = [1, 0], sizes = [1, 1], strides = [1, 1]} : vector<3x1xf32> to vector<1x1xf32>
      %c1_59 = arith.constant 1 : index
      %c0_60 = arith.constant 0 : index
      %97 = vector.load %arg6[%c1_59, %c0_60] : memref<3x32xf32, #tpu.memory_space<vmem>>, vector<1x32xf32>
      %98 = vector.broadcast %96 : vector<1x1xf32> to vector<1x32xf32>
      %99 = arith.mulf %98, %97 : vector<1x32xf32>
      %100 = arith.addf %95, %99 : vector<1x32xf32>
      %101 = vector.extract_strided_slice %91 {offsets = [2, 0], sizes = [1, 1], strides = [1, 1]} : vector<3x1xf32> to vector<1x1xf32>
      %c2_61 = arith.constant 2 : index
      %c0_62 = arith.constant 0 : index
      %102 = vector.load %arg6[%c2_61, %c0_62] : memref<3x32xf32, #tpu.memory_space<vmem>>, vector<1x32xf32>
      %103 = vector.broadcast %101 : vector<1x1xf32> to vector<1x32xf32>
      %104 = arith.mulf %103, %102 : vector<1x32xf32>
      %105 = arith.addf %100, %104 : vector<1x32xf32>
      %c0_63 = arith.constant 0 : index
      %c0_64 = arith.constant 0 : index
      %106 = vector.load %arg7[%c0_63, %c0_64] : memref<1x32xf32, #tpu.memory_space<vmem>>, vector<1x32xf32>
      %107 = arith.addf %105, %106 : vector<1x32xf32>
      %108 = vector.shape_cast %90 : vector<1x32xf32> to vector<1x32xf32>
      %109 = vector.broadcast %108 : vector<1x32xf32> to vector<4x32xf32>
      %c4 = arith.constant 4 : index
      %c0_65 = arith.constant 0 : index
      %110 = vector.load %arg20[%c4, %c0_65] : memref<8x32xf32, #tpu.memory_space<vmem>>, vector<4x32xf32>
      tpu.vector_store %arg20[%c4, %c0_65], %109 {strides = array<i32>} : memref<8x32xf32, #tpu.memory_space<vmem>>, vector<4x32xf32>,
      %111 = vector.shape_cast %107 : vector<1x32xf32> to vector<1x32xf32>
      %112 = vector.broadcast %111 : vector<1x32xf32> to vector<4x32xf32>
      %c4_66 = arith.constant 4 : index
      %c0_67 = arith.constant 0 : index
      %113 = vector.load %arg21[%c4_66, %c0_67] : memref<8x32xf32, #tpu.memory_space<vmem>>, vector<4x32xf32>
      tpu.vector_store %arg21[%c4_66, %c0_67], %112 {strides = array<i32>} : memref<8x32xf32, #tpu.memory_space<vmem>>, vector<4x32xf32>,
      %c0_68 = arith.constant 0 : index
      %c0_69 = arith.constant 0 : index
      %114 = vector.load %arg8[%c0_68, %c0_69] : memref<32x64xf32, #tpu.memory_space<vmem>>, vector<32x64xf32>
      %cst_70 = arith.constant dense<0.000000e+00> : vector<1x64xf32>
      %115 = tpu.matmul %90, %114, %cst_70 {dimension_numbers = #tpu.dot_dimension_numbers<[1], [0], [0], [1], [0, 0, 1, 1], [], []>} : vector<1x32xf32>, vector<32x64xf32>, vector<1x64xf32> -> vector<1x64xf32>
      %c0_71 = arith.constant 0 : index
      %c0_72 = arith.constant 0 : index
      %116 = vector.load %arg9[%c0_71, %c0_72] : memref<32x64xf32, #tpu.memory_space<vmem>>, vector<32x64xf32>
      %cst_73 = arith.constant dense<0.000000e+00> : vector<1x64xf32>
      %117 = tpu.matmul %107, %116, %cst_73 {dimension_numbers = #tpu.dot_dimension_numbers<[1], [0], [0], [1], [0, 0, 1, 1], [], []>} : vector<1x32xf32>, vector<32x64xf32>, vector<1x64xf32> -> vector<1x64xf32>
      %118 = arith.addf %115, %117 : vector<1x64xf32>
      %c0_74 = arith.constant 0 : index
      %c0_75 = arith.constant 0 : index
      %119 = vector.load %arg11[%c0_74, %c0_75] : memref<1x64xf32, #tpu.memory_space<vmem>>, vector<1x64xf32>
      %120 = arith.addf %118, %119 : vector<1x64xf32>
      %121 = vector.shape_cast %120 : vector<1x64xf32> to vector<1x64xf32>
      %122 = vector.broadcast %121 : vector<1x64xf32> to vector<4x64xf32>
      %c4_76 = arith.constant 4 : index
      %c0_77 = arith.constant 0 : index
      %123 = vector.load %arg25[%c4_76, %c0_77] : memref<8x64xf32, #tpu.memory_space<vmem>>, vector<4x64xf32>
      tpu.vector_store %arg25[%c4_76, %c0_77], %122 {strides = array<i32>} : memref<8x64xf32, #tpu.memory_space<vmem>>, vector<4x64xf32>,
      %c0_78 = arith.constant 0 : index
      %c0_79 = arith.constant 0 : index
      %124 = vector.load %arg3[%c0_78, %c0_79] : memref<8x3xf32, #tpu.memory_space<vmem>>, vector<8x3xf32>
      %c0_80 = arith.constant 0 : index
      %c0_81 = arith.constant 0 : index
      %125 = vector.load %arg25[%c0_80, %c0_81] : memref<8x64xf32, #tpu.memory_space<vmem>>, vector<8x64xf32>
      %126 = vector.extract_strided_slice %124 {offsets = [0, 0], sizes = [8, 1], strides = [1, 1]} : vector<8x3xf32> to vector<8x1xf32>
      %c0_82 = arith.constant 0 : index
      %c0_83 = arith.constant 0 : index
      %127 = vector.load %arg10[%c0_82, %c0_83] : memref<3x64xf32, #tpu.memory_space<vmem>>, vector<1x64xf32>
      %128 = vector.broadcast %126 : vector<8x1xf32> to vector<8x64xf32>
      %129 = vector.broadcast %127 : vector<1x64xf32> to vector<8x64xf32>
      %130 = arith.mulf %128, %129 : vector<8x64xf32>
      %131 = vector.extract_strided_slice %124 {offsets = [0, 1], sizes = [8, 1], strides = [1, 1]} : vector<8x3xf32> to vector<8x1xf32>
      %c1_84 = arith.constant 1 : index
      %c0_85 = arith.constant 0 : index
      %132 = vector.load %arg10[%c1_84, %c0_85] : memref<3x64xf32, #tpu.memory_space<vmem>>, vector<1x64xf32>
      %133 = vector.broadcast %131 : vector<8x1xf32> to vector<8x64xf32>
      %134 = vector.broadcast %132 : vector<1x64xf32> to vector<8x64xf32>
      %135 = arith.mulf %133, %134 : vector<8x64xf32>
      %136 = arith.addf %130, %135 : vector<8x64xf32>
      %137 = vector.extract_strided_slice %124 {offsets = [0, 2], sizes = [8, 1], strides = [1, 1]} : vector<8x3xf32> to vector<8x1xf32>
      %c2_86 = arith.constant 2 : index
      %c0_87 = arith.constant 0 : index
      %138 = vector.load %arg10[%c2_86, %c0_87] : memref<3x64xf32, #tpu.memory_space<vmem>>, vector<1x64xf32>
      %139 = vector.broadcast %137 : vector<8x1xf32> to vector<8x64xf32>
      %140 = vector.broadcast %138 : vector<1x64xf32> to vector<8x64xf32>
      %141 = arith.mulf %139, %140 : vector<8x64xf32>
      %142 = arith.addf %136, %141 : vector<8x64xf32>
      %143 = arith.addf %125, %142 : vector<8x64xf32>
      %cst_88 = arith.constant dense<0.000000e+00> : vector<64xf32>
      %144 = vector.multi_reduction <add>, %143, %cst_88 [0] : vector<8x64xf32> to vector<64xf32>
      %145 = vector.shape_cast %144 : vector<64xf32> to vector<1x64xf32>
      %cst_89 = arith.constant 8.000000e+00 : f32
      %146 = vector.broadcast %cst_89 : f32 to vector<1x64xf32>
      %147 = arith.divf %145, %146 : vector<1x64xf32>
      %148 = vector.broadcast %147 : vector<1x64xf32> to vector<8x64xf32>
      %149 = arith.subf %143, %148 : vector<8x64xf32>
      %150 = arith.mulf %149, %149 : vector<8x64xf32>
      %cst_90 = arith.constant dense<0.000000e+00> : vector<64xf32>
      %151 = vector.multi_reduction <add>, %150, %cst_90 [0] : vector<8x64xf32> to vector<64xf32>
      %152 = vector.shape_cast %151 : vector<64xf32> to vector<1x64xf32>
      %cst_91 = arith.constant 8.000000e+00 : f32
      %153 = vector.broadcast %cst_91 : f32 to vector<1x64xf32>
      %154 = arith.divf %152, %153 : vector<1x64xf32>
      %cst_92 = arith.constant 9.99999974E-6 : f32
      %155 = vector.broadcast %cst_92 : f32 to vector<1x64xf32>
      %156 = arith.addf %154, %155 : vector<1x64xf32>
      %157 = math.rsqrt %156 : vector<1x64xf32>
      %158 = vector.broadcast %157 : vector<1x64xf32> to vector<8x64xf32>
      %159 = arith.mulf %149, %158 : vector<8x64xf32>
      %c0_93 = arith.constant 0 : index
      %c0_94 = arith.constant 0 : index
      %160 = vector.load %arg12[%c0_93, %c0_94] : memref<1x64xf32, #tpu.memory_space<vmem>>, vector<1x64xf32>
      %161 = vector.broadcast %160 : vector<1x64xf32> to vector<8x64xf32>
      %162 = arith.mulf %159, %161 : vector<8x64xf32>
      %c0_95 = arith.constant 0 : index
      %c0_96 = arith.constant 0 : index
      %163 = vector.load %arg13[%c0_95, %c0_96] : memref<1x64xf32, #tpu.memory_space<vmem>>, vector<1x64xf32>
      %164 = vector.broadcast %163 : vector<1x64xf32> to vector<8x64xf32>
      %165 = arith.addf %162, %164 : vector<8x64xf32>
      %cst_97 = arith.constant 0.000000e+00 : f32
      %166 = vector.broadcast %cst_97 : f32 to vector<8x64xf32>
      %167 = arith.maximumf %165, %166 : vector<8x64xf32>
      %c0_98 = arith.constant 0 : index
      %c0_99 = arith.constant 0 : index
      %168 = vector.load %arg14[%c0_98, %c0_99] : memref<64x64xf32, #tpu.memory_space<vmem>>, vector<64x64xf32>
      %cst_100 = arith.constant dense<0.000000e+00> : vector<8x64xf32>
      %169 = tpu.matmul %167, %168, %cst_100 {dimension_numbers = #tpu.dot_dimension_numbers<[1], [0], [0], [1], [0, 0, 1, 1], [], []>} : vector<8x64xf32>, vector<64x64xf32>, vector<8x64xf32> -> vector<8x64xf32>
      %c0_101 = arith.constant 0 : index
      %c0_102 = arith.constant 0 : index
      %170 = vector.load %arg15[%c0_101, %c0_102] : memref<1x64xf32, #tpu.memory_space<vmem>>, vector<1x64xf32>
      %171 = vector.broadcast %170 : vector<1x64xf32> to vector<8x64xf32>
      %172 = arith.addf %169, %171 : vector<8x64xf32>
      %cst_103 = arith.constant dense<0.000000e+00> : vector<64xf32>
      %173 = vector.multi_reduction <add>, %172, %cst_103 [0] : vector<8x64xf32> to vector<64xf32>
      %174 = vector.shape_cast %173 : vector<64xf32> to vector<1x64xf32>
      %cst_104 = arith.constant 8.000000e+00 : f32
      %175 = vector.broadcast %cst_104 : f32 to vector<1x64xf32>
      %176 = arith.divf %174, %175 : vector<1x64xf32>
      %177 = vector.broadcast %176 : vector<1x64xf32> to vector<8x64xf32>
      %178 = arith.subf %172, %177 : vector<8x64xf32>
      %179 = arith.mulf %178, %178 : vector<8x64xf32>
      %cst_105 = arith.constant dense<0.000000e+00> : vector<64xf32>
      %180 = vector.multi_reduction <add>, %179, %cst_105 [0] : vector<8x64xf32> to vector<64xf32>
      %181 = vector.shape_cast %180 : vector<64xf32> to vector<1x64xf32>
      %cst_106 = arith.constant 8.000000e+00 : f32
      %182 = vector.broadcast %cst_106 : f32 to vector<1x64xf32>
      %183 = arith.divf %181, %182 : vector<1x64xf32>
      %cst_107 = arith.constant 9.99999974E-6 : f32
      %184 = vector.broadcast %cst_107 : f32 to vector<1x64xf32>
      %185 = arith.addf %183, %184 : vector<1x64xf32>
      %186 = math.rsqrt %185 : vector<1x64xf32>
      %187 = vector.broadcast %186 : vector<1x64xf32> to vector<8x64xf32>
      %188 = arith.mulf %178, %187 : vector<8x64xf32>
      %c0_108 = arith.constant 0 : index
      %c0_109 = arith.constant 0 : index
      %189 = vector.load %arg16[%c0_108, %c0_109] : memref<1x64xf32, #tpu.memory_space<vmem>>, vector<1x64xf32>
      %190 = vector.broadcast %189 : vector<1x64xf32> to vector<8x64xf32>
      %191 = arith.mulf %188, %190 : vector<8x64xf32>
      %c0_110 = arith.constant 0 : index
      %c0_111 = arith.constant 0 : index
      %192 = vector.load %arg17[%c0_110, %c0_111] : memref<1x64xf32, #tpu.memory_space<vmem>>, vector<1x64xf32>
      %193 = vector.broadcast %192 : vector<1x64xf32> to vector<8x64xf32>
      %194 = arith.addf %191, %193 : vector<8x64xf32>
      %cst_112 = arith.constant 0.000000e+00 : f32
      %195 = vector.broadcast %cst_112 : f32 to vector<8x64xf32>
      %196 = arith.maximumf %194, %195 : vector<8x64xf32>
      %c0_113 = arith.constant 0 : index
      %c0_114 = arith.constant 0 : index
      %197 = vector.load %arg18[%c0_113, %c0_114] : memref<3x64xf32, #tpu.memory_space<vmem>>, vector<1x64xf32>
      %198 = vector.broadcast %197 : vector<1x64xf32> to vector<8x64xf32>
      %199 = arith.mulf %196, %198 : vector<8x64xf32>
      %cst_115 = arith.constant dense<0.000000e+00> : vector<8xf32>
      %200 = vector.multi_reduction <add>, %199, %cst_115 [1] : vector<8x64xf32> to vector<8xf32>
      %201 = vector.shape_cast %200 : vector<8xf32> to vector<8x1xf32>
      %c0_116 = arith.constant 0 : index
      %c0_117 = arith.constant 0 : index
      %202 = vector.load %arg19[%c0_116, %c0_117] : memref<1x3xf32, #tpu.memory_space<vmem>>, vector<1x1xf32>
      %203 = vector.broadcast %202 : vector<1x1xf32> to vector<8x1xf32>
      %204 = arith.addf %201, %203 : vector<8x1xf32>
      %cst_118 = arith.constant 0.000000e+00 : f32
      %205 = vector.broadcast %cst_118 : f32 to vector<8x1xf32>
      %206 = arith.subf %205, %204 : vector<8x1xf32>
      %207 = math.exp %206 : vector<8x1xf32>
      %cst_119 = arith.constant 1.000000e+00 : f32
      %208 = vector.broadcast %cst_119 : f32 to vector<8x1xf32>
      %209 = arith.addf %208, %207 : vector<8x1xf32>
      %cst_120 = arith.constant 1.000000e+00 : f32
      %210 = vector.broadcast %cst_120 : f32 to vector<8x1xf32>
      %211 = arith.divf %210, %209 : vector<8x1xf32>
      %c0_121 = arith.constant 0 : index
      %c0_122 = arith.constant 0 : index
      %212 = vector.load %arg22[%c0_121, %c0_122] : memref<8x3xf32, #tpu.memory_space<vmem>>, vector<8x1xf32>
      tpu.vector_store %arg22[%c0_121, %c0_122], %211 {strides = array<i32>} : memref<8x3xf32, #tpu.memory_space<vmem>>, vector<8x1xf32>,
      %c1_123 = arith.constant 1 : index
      %c0_124 = arith.constant 0 : index
      %213 = vector.load %arg18[%c1_123, %c0_124] : memref<3x64xf32, #tpu.memory_space<vmem>>, vector<1x64xf32>
      %214 = vector.broadcast %213 : vector<1x64xf32> to vector<8x64xf32>
      %215 = arith.mulf %196, %214 : vector<8x64xf32>
      %cst_125 = arith.constant dense<0.000000e+00> : vector<8xf32>
      %216 = vector.multi_reduction <add>, %215, %cst_125 [1] : vector<8x64xf32> to vector<8xf32>
      %217 = vector.shape_cast %216 : vector<8xf32> to vector<8x1xf32>
      %c0_126 = arith.constant 0 : index
      %c1_127 = arith.constant 1 : index
      %218 = vector.load %arg19[%c0_126, %c1_127] : memref<1x3xf32, #tpu.memory_space<vmem>>, vector<1x1xf32>
      %219 = vector.broadcast %218 : vector<1x1xf32> to vector<8x1xf32>
      %220 = arith.addf %217, %219 : vector<8x1xf32>
      %cst_128 = arith.constant 0.000000e+00 : f32
      %221 = vector.broadcast %cst_128 : f32 to vector<8x1xf32>
      %222 = arith.subf %221, %220 : vector<8x1xf32>
      %223 = math.exp %222 : vector<8x1xf32>
      %cst_129 = arith.constant 1.000000e+00 : f32
      %224 = vector.broadcast %cst_129 : f32 to vector<8x1xf32>
      %225 = arith.addf %224, %223 : vector<8x1xf32>
      %cst_130 = arith.constant 1.000000e+00 : f32
      %226 = vector.broadcast %cst_130 : f32 to vector<8x1xf32>
      %227 = arith.divf %226, %225 : vector<8x1xf32>
      %c0_131 = arith.constant 0 : index
      %c1_132 = arith.constant 1 : index
      %228 = vector.load %arg22[%c0_131, %c1_132] : memref<8x3xf32, #tpu.memory_space<vmem>>, vector<8x1xf32>
      tpu.vector_store %arg22[%c0_131, %c1_132], %227 {strides = array<i32>} : memref<8x3xf32, #tpu.memory_space<vmem>>, vector<8x1xf32>,
      %c2_133 = arith.constant 2 : index
      %c0_134 = arith.constant 0 : index
      %229 = vector.load %arg18[%c2_133, %c0_134] : memref<3x64xf32, #tpu.memory_space<vmem>>, vector<1x64xf32>
      %230 = vector.broadcast %229 : vector<1x64xf32> to vector<8x64xf32>
      %231 = arith.mulf %196, %230 : vector<8x64xf32>
      %cst_135 = arith.constant dense<0.000000e+00> : vector<8xf32>
      %232 = vector.multi_reduction <add>, %231, %cst_135 [1] : vector<8x64xf32> to vector<8xf32>
      %233 = vector.shape_cast %232 : vector<8xf32> to vector<8x1xf32>
      %c0_136 = arith.constant 0 : index
      %c2_137 = arith.constant 2 : index
      %234 = vector.load %arg19[%c0_136, %c2_137] : memref<1x3xf32, #tpu.memory_space<vmem>>, vector<1x1xf32>
      %235 = vector.broadcast %234 : vector<1x1xf32> to vector<8x1xf32>
      %236 = arith.addf %233, %235 : vector<8x1xf32>
      %cst_138 = arith.constant 0.000000e+00 : f32
      %237 = vector.broadcast %cst_138 : f32 to vector<8x1xf32>
      %238 = arith.subf %237, %236 : vector<8x1xf32>
      %239 = math.exp %238 : vector<8x1xf32>
      %cst_139 = arith.constant 1.000000e+00 : f32
      %240 = vector.broadcast %cst_139 : f32 to vector<8x1xf32>
      %241 = arith.addf %240, %239 : vector<8x1xf32>
      %cst_140 = arith.constant 1.000000e+00 : f32
      %242 = vector.broadcast %cst_140 : f32 to vector<8x1xf32>
      %243 = arith.divf %242, %241 : vector<8x1xf32>
      %c0_141 = arith.constant 0 : index
      %c2_142 = arith.constant 2 : index
      %244 = vector.load %arg22[%c0_141, %c2_142] : memref<8x3xf32, #tpu.memory_space<vmem>>, vector<8x1xf32>
      tpu.vector_store %arg22[%c0_141, %c2_142], %243 {strides = array<i32>} : memref<8x3xf32, #tpu.memory_space<vmem>>, vector<8x1xf32>,
    } else {
    }
    return
  }
  func.func @transform_0(%arg0: i32) -> (i32, i32) {
    %c0_i32 = arith.constant 0 : i32
    %c0_i32_0 = arith.constant 0 : i32
    return %c0_i32, %arg0 : i32, i32
  }
  func.func @transform_1(%arg0: i32) -> (i32, i32) {
    %c0_i32 = arith.constant 0 : i32
    %c0_i32_0 = arith.constant 0 : i32
    return %c0_i32, %arg0 : i32, i32
  }
  func.func @transform_2(%arg0: i32) -> (i32, i32) {
    %c0_i32 = arith.constant 0 : i32
    %c0_i32_0 = arith.constant 0 : i32
    %c0_i32_1 = arith.constant 0 : i32
    return %c0_i32, %c0_i32_0 : i32, i32
  }
  func.func @transform_3(%arg0: i32) -> (i32, i32) {
    %c0_i32 = arith.constant 0 : i32
    %c0_i32_0 = arith.constant 0 : i32
    %c0_i32_1 = arith.constant 0 : i32
    return %c0_i32, %c0_i32_0 : i32, i32
  }
  func.func @transform_4(%arg0: i32) -> (i32, i32) {
    %c0_i32 = arith.constant 0 : i32
    %c0_i32_0 = arith.constant 0 : i32
    %c0_i32_1 = arith.constant 0 : i32
    return %c0_i32, %c0_i32_0 : i32, i32
  }
  func.func @transform_5(%arg0: i32) -> (i32, i32) {
    %c0_i32 = arith.constant 0 : i32
    %c0_i32_0 = arith.constant 0 : i32
    %c0_i32_1 = arith.constant 0 : i32
    return %c0_i32, %c0_i32_0 : i32, i32
  }
  func.func @transform_6(%arg0: i32) -> (i32, i32) {
    %c0_i32 = arith.constant 0 : i32
    %c0_i32_0 = arith.constant 0 : i32
    %c0_i32_1 = arith.constant 0 : i32
    return %c0_i32, %c0_i32_0 : i32, i32
  }
  func.func @transform_7(%arg0: i32) -> (i32, i32) {
    %c0_i32 = arith.constant 0 : i32
    %c0_i32_0 = arith.constant 0 : i32
    %c0_i32_1 = arith.constant 0 : i32
    return %c0_i32, %c0_i32_0 : i32, i32
  }
  func.func @transform_8(%arg0: i32) -> (i32, i32) {
    %c0_i32 = arith.constant 0 : i32
    %c0_i32_0 = arith.constant 0 : i32
    %c0_i32_1 = arith.constant 0 : i32
    return %c0_i32, %c0_i32_0 : i32, i32
  }
  func.func @transform_9(%arg0: i32) -> (i32, i32) {
    %c0_i32 = arith.constant 0 : i32
    %c0_i32_0 = arith.constant 0 : i32
    %c0_i32_1 = arith.constant 0 : i32
    return %c0_i32, %c0_i32_0 : i32, i32
  }
  func.func @transform_10(%arg0: i32) -> (i32, i32) {
    %c0_i32 = arith.constant 0 : i32
    %c0_i32_0 = arith.constant 0 : i32
    %c0_i32_1 = arith.constant 0 : i32
    return %c0_i32, %c0_i32_0 : i32, i32
  }
  func.func @transform_11(%arg0: i32) -> (i32, i32) {
    %c0_i32 = arith.constant 0 : i32
    %c0_i32_0 = arith.constant 0 : i32
    %c0_i32_1 = arith.constant 0 : i32
    return %c0_i32, %c0_i32_0 : i32, i32
  }
  func.func @transform_12(%arg0: i32) -> (i32, i32) {
    %c0_i32 = arith.constant 0 : i32
    %c0_i32_0 = arith.constant 0 : i32
    %c0_i32_1 = arith.constant 0 : i32
    return %c0_i32, %c0_i32_0 : i32, i32
  }
  func.func @transform_13(%arg0: i32) -> (i32, i32) {
    %c0_i32 = arith.constant 0 : i32
    %c0_i32_0 = arith.constant 0 : i32
    %c0_i32_1 = arith.constant 0 : i32
    return %c0_i32, %c0_i32_0 : i32, i32
  }
  func.func @transform_14(%arg0: i32) -> (i32, i32) {
    %c0_i32 = arith.constant 0 : i32
    %c0_i32_0 = arith.constant 0 : i32
    %c0_i32_1 = arith.constant 0 : i32
    return %c0_i32, %c0_i32_0 : i32, i32
  }
  func.func @transform_15(%arg0: i32) -> (i32, i32) {
    %c0_i32 = arith.constant 0 : i32
    %c0_i32_0 = arith.constant 0 : i32
    %c0_i32_1 = arith.constant 0 : i32
    return %c0_i32, %c0_i32_0 : i32, i32
  }
  func.func @transform_16(%arg0: i32) -> (i32, i32) {
    %c0_i32 = arith.constant 0 : i32
    %c0_i32_0 = arith.constant 0 : i32
    %c0_i32_1 = arith.constant 0 : i32
    return %c0_i32, %c0_i32_0 : i32, i32
  }
  func.func @transform_17(%arg0: i32) -> (i32, i32) {
    %c0_i32 = arith.constant 0 : i32
    %c0_i32_0 = arith.constant 0 : i32
    %c0_i32_1 = arith.constant 0 : i32
    return %c0_i32, %c0_i32_0 : i32, i32
  }
  func.func @transform_18(%arg0: i32) -> (i32, i32) {
    %c0_i32 = arith.constant 0 : i32
    %c0_i32_0 = arith.constant 0 : i32
    %c0_i32_1 = arith.constant 0 : i32
    return %c0_i32, %c0_i32_0 : i32, i32
  }
  func.func @transform_19(%arg0: i32) -> (i32, i32) {
    %c0_i32 = arith.constant 0 : i32
    %c0_i32_0 = arith.constant 0 : i32
    %c0_i32_1 = arith.constant 0 : i32
    return %c0_i32, %c0_i32_0 : i32, i32
  }
  func.func @transform_20(%arg0: i32) -> (i32, i32) {
    %c0_i32 = arith.constant 0 : i32
    %c0_i32_0 = arith.constant 0 : i32
    %c0_i32_1 = arith.constant 0 : i32
    return %c0_i32, %c0_i32_0 : i32, i32
  }
  func.func @transform_21(%arg0: i32) -> (i32, i32) {
    %c0_i32 = arith.constant 0 : i32
    %c0_i32_0 = arith.constant 0 : i32
    %c0_i32_1 = arith.constant 0 : i32
    return %c0_i32, %c0_i32_0 : i32, i32
  }
}

</mosaic_0001>

<bundles_post_ra>
// kernel: sysnet_forward.1
= control target key start
LH: loop header
LB: loop body
LE: loop exit
PB: predicated region body
PF: predicated region fallthrough
CT: control target
= control target key end

     0   :  { %s1453_s0 = inlined_call_operand.vmem [shape: f32[6,256], index: 0, kind: input, shape index: {}]   ;;  %s1454_s1 = inlined_call_operand.vmem [shape: f32[6,256], index: 1, kind: input, shape index: {}]   ;;  %s1455_s2 = inlined_call_operand.vmem [shape: f32[8,3], index: 2, kind: input, shape index: {}]   ;;  %s1456_s3 = inlined_call_operand.vmem [shape: f32[3,32], index: 3, kind: input, shape index: {}]   ;;  %s1457_s4 = inlined_call_operand.vmem [shape: f32[1,32], index: 4, kind: input, shape index: {}]   ;;  %s1458_s5 = inlined_call_operand.vmem [shape: f32[3,32], index: 5, kind: input, shape index: {}]   ;;  %s1459_s6 = inlined_call_operand.vmem [shape: f32[1,32], index: 6, kind: input, shape index: {}]   ;;  %s1460_s7 = inlined_call_operand.vmem [shape: f32[32,64], index: 7, kind: input, shape index: {}]   ;;  %s1461_s8 = inlined_call_operand.vmem [shape: f32[32,64], index: 8, kind: input, shape index: {}]   ;;  %s1462_s9 = inlined_call_operand.vmem [shape: f32[3,64], index: 9, kind: input, shape index: {}]   ;;  %s1463_s10 = inlined_call_operand.vmem [shape: f32[1,64], index: 10, kind: input, shape index: {}]   ;;  %s1464_s11 = inlined_call_operand.vmem [shape: f32[1,64], index: 11, kind: input, shape index: {}]   ;;  %s1465_s12 = inlined_call_operand.vmem [shape: f32[1,64], index: 12, kind: input, shape index: {}]   ;;  %s1466_s13 = inlined_call_operand.vmem [shape: f32[64,64], index: 13, kind: input, shape index: {}]   ;;  %s1467_s14 = inlined_call_operand.vmem [shape: f32[1,64], index: 14, kind: input, shape index: {}]   ;;  %s1468_s15 = inlined_call_operand.vmem [shape: f32[1,64], index: 15, kind: input, shape index: {}]   ;;  %s1469_s16 = inlined_call_operand.vmem [shape: f32[1,64], index: 16, kind: input, shape index: {}]   ;;  %s1470_s17 = inlined_call_operand.vmem [shape: f32[3,64], index: 17, kind: input, shape index: {}]   ;;  %s1471_s18 = inlined_call_operand.vmem [shape: f32[1,3], index: 18, kind: input, shape index: {}]   ;;  %s1472_s19 = inlined_call_operand.hbm [shape: f32[8,32], index: 19, kind: output, shape index: {0}]   ;;  %s1473_s20 = inlined_call_operand.hbm [shape: f32[8,32], index: 20, kind: output, shape index: {1}]   ;;  %s1474_s21 = inlined_call_operand.vmem [shape: f32[8,3], index: 21, kind: output, shape index: {2}]  }
   0x1   :  { %1480 = sst [smem:[#allocation11_spill]] %s1453_s0 }
   0x2   :  { %1481 = sst [smem:[#allocation12_spill]] %s1454_s1 }
   0x3   :  { %1482 = sst [smem:[#allocation13_spill]] %s1455_s2 }
   0x4   :  { %1483 = sst [smem:[#allocation14_spill]] %s1456_s3 }
   0x5   :  { %1484 = sst [smem:[#allocation15_spill]] %s1457_s4 }
   0x6   :  { %1485 = sst [smem:[#allocation16_spill]] %s1458_s5 }
   0x7   :  { %27 = vsyncpa [#allocation6], 0  ;;  %vm77_vm0 = vcmask 1045504   ;;  %s1486_s26 = sld [smem:[#allocation12_spill]]  ;;  %s1487_s0 = sld [smem:[#allocation11_spill]] }
   0xd   :  { %v87_v0 = vld [vmem:[%s1486_s26] sm:$0x3f]  ;;  %v88_v1 = vld [vmem:[%s1486_s26 + $0x8] sm:$0x3f] }
   0xe   :  { %v89_v2 = vsel %vm77_vm0, %v87_v0, 0.0  ;;  %v90_v3 = vsel %vm77_vm0, %v88_v1, 0.0  ;;  %v75_v4 = vld [vmem:[%s1487_s0] sm:$0x3f]  ;;  %v76_v5 = vld [vmem:[%s1487_s0 + $0x8] sm:$0x3f] }
   0xf   :  { %v91_v6 = vadd.f32 %v90_v3, %v89_v2  ;;  %v78_v7 = vsel %vm77_vm0, %v75_v4, 0.0  ;;  %v79_v8 = vsel %vm77_vm0, %v76_v5, 0.0 }
  0x10   :  { %28 = vsyncpa [#allocation8], 0  ;;  %v80_v9 = vadd.f32 %v79_v8, %v78_v7  ;;  %vm71_vm1 = vcmask 5120   ;;  %v1101_v10 = vmov 0.0   ;;  %v1102_v11 = vmov 0   ;;  %v172_v20 = vld [vmem:[%s1461_s8] sm:$0xff] }
  0x11   :  { %92 = vadd.xlane.f32.xlu0 %v91_v6  ;;  %73 = vst.msk [vmem:[#allocation3] sm:$0x3f] %vm71_vm1, %v1101_v10  ;;  %72 = vst.msk [vmem:[#allocation2] sm:$0x3f] %vm71_vm1, %v1101_v10  ;;  %1032 = vset.pattern.permute.xlu1 %v1102_v11  ;;  %v173_v21 = vld [vmem:[%s1461_s8 + $0x8] sm:$0xff]  ;;  %v1103_v25 = vmov 0.0|0.0   ;;  %v157_v45 = vlaneseq }
  0x12   :  { %1033 = vset.pattern.permute.xlu0 %v1102_v11  ;;  %v989_v23 = vpack.c.bf16 %v173_v21, %v172_v20  ;;  %988 = vmatprep.subr.bf16.mxu1 %v1103_v25  ;;  %v174_v26 = vld [vmem:[%s1461_s8 + $0x10] sm:$0xff]  ;;  %v175_v27 = vld [vmem:[%s1461_s8 + $0x18] sm:$0xff]  ;;  %vm1104_vm2 = vmmov 0   ;;  %s1488_s28 = sld [smem:[#allocation13_spill]]  ;;  %v1105_v30 = vmov 1   ;;  %v1106_v31 = vmov 2  }
  0x13   :  { %1000 = vmatprep.subr.bf16.mxu0 %v1103_v25  ;;  %v992_v28 = vpack.c.bf16 %v175_v27, %v174_v26  ;;  %933 = vmatprep.mubr.msk.f32.mxu1 %vm1104_vm2, %v1101_v10  ;;  %s1489_s0 = sld [smem:[#allocation16_spill]]  ;;  %s1490_s27 = sld [smem:[#allocation14_spill]]  ;;  %v158_v59 = vshrl.u32 %v157_v45, 7  ;;  %v168_v11 = vld [vmem:[%s1460_s7] sm:$0xff]  ;;  %vm176_vm3 = vcmask 261120   ;;  %vm161_vm4 = vcmask 257024  }
  0x14   :  { %990 = vmatpush3.bf16.msra.mxu1 %v989_v23  ;;  %1002 = vmatpush3.bf16.msra.mxu0 %v989_v23  ;;  %s1491_s1 = sld [smem:[#allocation15_spill]]  ;;  %vm329_vm5 = vcmask 519168   ;;  %vm602_vm6 = vcmask 523264  }
  0x15   :  { %81 = vadd.xlane.f32.xlu0 %v80_v9  ;;  %991 = vmatprep.subr.bf16.mxu1 %v1103_v25  ;;  %v155_v9 = vld [vmem:[%s1459_s6] sm:$0x1] }
  0x16   :  { %1003 = vmatprep.subr.bf16.mxu0 %v1103_v25  ;;  %955 = vmatprep.mubr.msk.f32.mxu0 %vm1104_vm2, %v1101_v10 }
  0x18   :  { %v86_v12 = vld [vmem:[#allocation3] sm:$0x3f]  ;;  %v74_v15 = vld [vmem:[#allocation2] sm:$0x3f]  ;;  %993 = vmatpush3.bf16.msra.mxu1 %v992_v28  ;;  %1005 = vmatpush3.bf16.msra.mxu0 %v992_v28 }
  0x19   :  { %994 = vmatprep.subr.bf16.mxu1 %v1103_v25  ;;  %1012 = vmatprep.subr.bf16.mxu0 %v1103_v25  ;;  %v566_v29 = vld [vmem:[%s1488_s28] sm:$0xff] }
  0x1a   :  { %v137_v32 = vld [vmem:[%s1489_s0 + $0x1] sm:$0x1]  ;;  %v146_v33 = vld [vmem:[%s1489_s0 + $0x2] sm:$0x1]  ;;  %v362_v38 = vld [vmem:[%s1489_s0] sm:$0x1] }
  0x1b   :  { %v367_v34 = vld [vmem:[%s1489_s0 + $0x1] sm:$0x1]  ;;  %v376_v35 = vld [vmem:[%s1489_s0 + $0x2] sm:$0x1]  ;;  %v139_v36 = vrot.slane %v137_v32, 7  ;;  %v148_v37 = vrot.slane %v146_v33, 6 }
  0x1c   :  { %v369_v39 = vrot.slane %v367_v34, 4  ;;  %v378_v40 = vrot.slane %v376_v35, 3  ;;  %v110_v41 = vld [vmem:[%s1490_s27 + $0x1] sm:$0x1]  ;;  %v119_v42 = vld [vmem:[%s1490_s27 + $0x2] sm:$0x1] }
  0x1d   :  { %v336_v43 = vld [vmem:[%s1490_s27 + $0x1] sm:$0x1]  ;;  %v345_v44 = vld [vmem:[%s1490_s27 + $0x2] sm:$0x1]  ;;  %v364_v46 = vrot.slane %v362_v38, 5  ;;  %v112_v51 = vrot.slane %v110_v41, 7 }
  0x1e   :  { %v130_v48 = vld [vmem:[%s1489_s0] sm:$0x1]  ;;  %v121_v52 = vrot.slane %v119_v42, 6  ;;  %v338_v56 = vrot.slane %v336_v43, 4  ;;  %v347_v57 = vrot.slane %v345_v44, 3  ;;  %v171_v32 = vld [vmem:[%s1460_s7 + $0x18] sm:$0xff] }
  0x1f   :  { %v331_v53 = vld [vmem:[%s1490_s27] sm:$0x1] }
  0x20   :  { %v103_v63 = vld [vmem:[%s1490_s27] sm:$0x1]  ;;  %v333_v0 = vrot.slane %v331_v53, 5 }
  0x21   :  { %v128_v33 = vld [vmem:[%s1491_s1] sm:$0x1] }
  0x22   :  { %v877_v35 = vld [vmem:[%s1491_s1] ss:$0 sm:$0xff] }
  0x2b   :  { %571 = vperm.xlu0 %1033, %v566_v29  }
  0x2f   :  { %1036 = vset.pattern.permute.xlu0 %v1106_v31 }
  0x9e   :  { %v93_v13 = vpop.xlane.xlu0 %92 }
  0x9f   :  { %v94_v14 = vadd.f32 %v93_v13, %v86_v12  ;;  %v169_v12 = vld [vmem:[%s1460_s7 + $0x8] sm:$0xff] }
  0xa0   :  { %v995_v26 = vpack.c.bf16 %v169_v12, %v168_v11 }
  0xa1   :  { %95 = vst.msk [vmem:[#allocation3] sm:$0x3f] %vm71_vm1, %v94_v14 }
  0xa2   :  { %v82_v16 = vpop.xlane.xlu0 %81 }
  0xa3   :  { %v83_v17 = vadd.f32 %v82_v16, %v74_v15  ;;  %v878_v16 = vld [vmem:[%s1459_s6] ss:$0 sm:$0xff] }
  0xa5   :  { %85 = vst.msk [vmem:[#allocation2] sm:$0x3f] %vm71_vm1, %v83_v17  ;;  %v1306_v17 = vsub.s32 0, %v158_v59 }
  0xa8   :  { %v101_v18 = vld [vmem:[#allocation3] sm:$0x3f] }
  0xa9   :  { %v102_v19 = vmul.f32 0.00390625, %v101_v18  ;;  %v395_v18 = vsub.s32 3, %v158_v59 }
  0xab   :  { %133 = vperm.xlu1 %1032, %v102_v19  }
  0xac   :  { %v99_v22 = vld [vmem:[#allocation2] sm:$0x3f] }
  0xad   :  { %v100_v24 = vmul.f32 0.00390625, %v99_v22 }
  0xaf   :  { %106 = vperm.xlu1 %1032, %v100_v24  }
  0xb3   :  { %1034 = vset.pattern.permute.xlu1 %v1105_v30 }
  0xb4   :  { %581 = vperm.xlu1 %1034, %v566_v29  }
  0xb8   :  { %1035 = vset.pattern.permute.xlu1 %v1106_v31  ;;  %v170_v31 = vld [vmem:[%s1460_s7 + $0x10] sm:$0xff] }
  0xb9   :  { %592 = vperm.xlu1 %1035, %v566_v29  }
 0x12a   :  { %v134_v47 = vpop.permute.xlu1 %133 }
 0x12b   :  { %v141_v49 = vmul.f32 %v139_v36, %v134_v47  ;;  %v150_v50 = vmul.f32 %v148_v37, %v134_v47  ;;  %v371_v54 = vmul.f32 %v369_v39, %v134_v47  ;;  %v380_v55 = vmul.f32 %v378_v40, %v134_v47 }
 0x12c   :  { %v136_v60 = vmul.f32 %v134_v47, %v130_v48  ;;  %v366_v61 = vmul.f32 %v364_v46, %v134_v47  ;;  %v998_v40 = vpack.c.bf16 %v171_v32, %v170_v31  ;;  %v642_v46 = vld [vmem:[%s1466_s13] sm:$0xff]  ;;  %v643_v47 = vld [vmem:[%s1466_s13 + $0x8] sm:$0xff] }
 0x12d   :  { %v143_v58 = vrot.slane %v141_v49, 1  ;;  %v373_v62 = vrot.slane %v371_v54, 1  ;;  %v382_v2 = vrot.slane %v380_v55, 2  ;;  %v152_v5 = vrot.slane %v150_v50, 2  ;;  %v645_v49 = vld [vmem:[%s1466_s13 + $0x18] sm:$0xff]  ;;  %v648_v54 = vld [vmem:[%s1466_s13 + $0x30] sm:$0xff] }
 0x12e   :  { %v107_v1 = vpop.permute.xlu1 %106  ;;  %v1013_v48 = vpack.c.bf16 %v643_v47, %v642_v46  ;;  %v649_v55 = vld [vmem:[%s1466_s13 + $0x38] sm:$0xff] }
 0x12f   :  { %v114_v3 = vmul.f32 %v112_v51, %v107_v1  ;;  %v123_v4 = vmul.f32 %v121_v52, %v107_v1  ;;  %v340_v6 = vmul.f32 %v338_v56, %v107_v1  ;;  %v349_v7 = vmul.f32 %v347_v57, %v107_v1  ;;  %v646_v51 = vld [vmem:[%s1466_s13 + $0x20] sm:$0xff]  ;;  %v647_v52 = vld [vmem:[%s1466_s13 + $0x28] sm:$0xff] }
 0x130   :  { %v145_v8 = vadd.f32 %v143_v58, %v136_v60  ;;  %v375_v13 = vadd.f32 %v373_v62, %v366_v61  ;;  %v109_v14 = vmul.f32 %v107_v1, %v103_v63  ;;  %v335_v19 = vmul.f32 %v333_v0, %v107_v1  ;;  %v323_v62 = vld [vmem:[%s1463_s10] sm:$0x1] }
 0x131   :  { %v116_v15 = vrot.slane %v114_v3, 1  ;;  %v342_v20 = vrot.slane %v340_v6, 1  ;;  %v125_v24 = vrot.slane %v123_v4, 2  ;;  %v351_v28 = vrot.slane %v349_v7, 2  ;;  %v559_v3 = vld [vmem:[%s1463_s10] sm:$0x1] }
 0x132   :  { %v154_v21 = vadd.f32 %v152_v5, %v145_v8  ;;  %v384_v22 = vadd.f32 %v382_v2, %v375_v13  ;;  %v1019_v53 = vpack.c.bf16 %v647_v52, %v646_v51  ;;  %v1022_v56 = vpack.c.bf16 %v649_v55, %v648_v54  ;;  %v882_v7 = vld [vmem:[%s1462_s9 + $0x1] ss:$0 sm:$0xff]  ;;  %v881_v8 = vld [vmem:[%s1462_s9] ss:$0 sm:$0xff] }
 0x133   :  { %v118_v23 = vadd.f32 %v116_v15, %v109_v14  ;;  %v344_v27 = vadd.f32 %v342_v20, %v335_v19  ;;  %v582_v4 = vpop.permute.xlu1 %581  ;;  %v883_v15 = vld [vmem:[%s1462_s9 + $0x2] ss:$0 sm:$0xff] }
 0x134   :  { %v156_v29 = vadd.f32 %v155_v9, %v154_v21  ;;  %v392_v30 = vadd.f32 %v878_v16, %v384_v22  ;;  %v572_v9 = vpop.permute.xlu0 %571  ;;  %v588_v13 = vmul.f32 %v882_v7, %v582_v4  ;;  %v888_v7 = vld [vmem:[%s1468_s15] ss:$0 sm:$0xff]  ;;  %s1107_s15 = smov [#allocation5]  }
 0x135   :  { %v127_v34 = vadd.f32 %v125_v24, %v118_v23  ;;  %v353_v36 = vadd.f32 %v351_v28, %v344_v27  ;;  %v578_v14 = vmul.f32 %v881_v8, %v572_v9  ;;  %v889_v9 = vld [vmem:[%s1469_s16] ss:$0 sm:$0xff]  ;;  %s849_s16 = sshll.u32 %s1107_s15, 4  ;;  %s850_s16 = int_to_ptr.vmem [resolvable:$true] %s849_s16 }
 0x136   :  { %934 = vmatmul.mubr.msk.f32.vlgmr.msra.gmra.mrb[0].mxu1 %vm176_vm3, %v156_v29  ;;  %v412_v37 = vrot.slane %v392_v30, 3  ;;  %v166_v38 = vrot.slane %v156_v29, %v1306_v17  ;;  %v401_v39 = vrot.slane %v392_v30, %v395_v18  ;;  %s1053_s0 = scalar_lea.vmem %s850_s16, 128  ;;  %p1058_p1 = scmp.lt.s32.totalorder %s850_s16, %s850_s16 }
 0x137   :  { %996 = vmatpush3.bf16.msra.mxu1 %v995_v26  ;;  %944 = vmatprep.mubr.msk.f32.mxu1 %vm1104_vm2, %v1101_v10  ;;  %v129_v41 = vadd.f32 %v128_v33, %v127_v34  ;;  %v361_v42 = vadd.f32 %v877_v35, %v353_v36  ;;  %p1054_p0 = scmp.ne.s32.totalorder %s850_s16, %s1053_s0  ;;  %p1059_p2 = scmp.lt.s32.totalorder %s1053_s0, %s1053_s0 }
 0x138   :  { %956 = vmatmul.mubr.msk.f32.vlgmr.msra.gmra.mrb[0].mxu0 %vm176_vm3, %v412_v37  ;;  %997 = vmatprep.subr.bf16.mxu1 %v1103_v25  ;;  %167 = vst.msk [vmem:[#allocation7] sm:$0xf] %vm161_vm4, %v166_v38  ;;  %402 = vst.msk [vmem:[#allocation7 + $0x4] sm:$0xf] %vm161_vm4, %v401_v39  ;;  %v593_v16 = vpop.permute.xlu1 %592 }
 0x139   :  { %985 = vmatprep.mubr.msk.f32.mxu0 %vm1104_vm2, %v1101_v10  ;;  %v160_v43 = vrot.slane %v129_v41, %v1306_v17  ;;  %v396_v44 = vrot.slane %v361_v42, %v395_v18  ;;  %v486_v45 = vrot.slane %v361_v42, 3  ;;  %1014 = vmatpush3.bf16.msra.mxu0 %v1013_v48  ;;  %v589_v18 = vadd.f32 %v588_v13, %v578_v14  ;;  %v892_v13 = vld [vmem:[%s1470_s17 + $0x1] ss:$0 sm:$0xff]  ;;  %v890_v14 = vld [vmem:[%s1470_s17] ss:$0 sm:$0xff]  ;;  %p1060_p3 = por %p1059_p2, %p1058_p1 }
 0x13a   :  { %1015 = vmatprep.subr.bf16.mxu0 %v1103_v25  ;;  %v599_v19 = vmul.f32 %v883_v15, %v593_v16  ;;  %v894_v16 = vld [vmem:[%s1470_s17 + $0x2] ss:$0 sm:$0xff] }
 0x13b   :  { %999 = vmatpush3.bf16.msra.mxu1 %v998_v40  ;;  %162 = vst.msk [vmem:[#allocation5] sm:$0xf] %vm161_vm4, %v160_v43  ;;  %397 = vst.msk [vmem:[#allocation5 + $0x4] sm:$0xf] %vm161_vm4, %v396_v44  ;;  %v884_v43 = vld [vmem:[%s1464_s11] ss:$0 sm:$0xff]  ;;  %p1061_p4 = pnand %p1060_p3, %p1054_p0 }
 0x13c   :  { %1006 = vmatprep.subr.bf16.mxu1 %v1103_v25  ;;  %v600_v20 = vadd.f32 %v599_v19, %v589_v18 }
 0x13e   :  { %945 = vmatmul.mubr.msk.f32.vlgmr.msra.gmra.mrb[2].mxu1 %vm176_vm3, %v129_v41 }
 0x13f   :  { %1008 = vmatpush3.bf16.msra.mxu1 %v995_v26  ;;  %966 = vmatprep.mubr.msk.f32.mxu1 %vm1104_vm2, %v1101_v10  ;;  %v644_v10 = vld [vmem:[%s1466_s13 + $0x10] sm:$0xff]  ;;  %s1108_s13 = smov [#allocation7]  }
 0x140   :  { %1009 = vmatprep.subr.bf16.mxu1 %v1103_v25  ;;  %v1016_v50 = vpack.c.bf16 %v645_v49, %v644_v10  ;;  %v886_v10 = vld [vmem:[%s1467_s14] ss:$0 sm:$0xff]  ;;  %s859_s7 = sshll.u32 %s1108_s13, 4  ;;  %s860_s7 = int_to_ptr.vmem [resolvable:$true] %s859_s7 }
 0x142   :  { %1017 = vmatpush3.bf16.msra.mxu0 %v1016_v50 }
 0x143   :  { %1011 = vmatpush3.bf16.msra.mxu1 %v998_v40  ;;  %1018 = vmatprep.subr.bf16.mxu0 %v1103_v25 }
 0x146   :  { %967 = vmatmul.mubr.msk.f32.vlgmr.msra.gmra.mrb[4].mxu1 %vm176_vm3, %v486_v45  ;;  %1020 = vmatpush3.bf16.msra.mxu0 %v1019_v53  ;;  %v885_v45 = vld [vmem:[%s1465_s12] ss:$0 sm:$0xff] }
 0x147   :  { %1021 = vmatprep.subr.bf16.mxu0 %v1103_v25 }
 0x14a   :  { %1023 = vmatpush3.bf16.msra.mxu0 %v1022_v56 }
 0x209   :  { %v246_v57 = vpop.f32.mrb[0].mxu1 }
 0x20a   :  { %v935_v58 = vpop.f32.mrb[1].mxu1 }
 0x20b   :  { %v481_v59 = vpop.f32.mrb[0].mxu0 }
 0x20c   :  { %v957_v60 = vpop.f32.mrb[1].mxu0 }
 0x211   :  { %v319_v61 = vpop.f32.mrb[2].mxu1 }
 0x212   :  { %v320_v25 = vadd.f32 %v319_v61, %v246_v57  ;;  %v946_v63 = vpop.f32.mrb[3].mxu1 }
 0x214   :  { %v324_v0 = vadd.f32 %v323_v62, %v320_v25 }
 0x216   :  { %v328_v1 = vrot.slane %v324_v0, %v1306_v17 }
 0x218   :  { %330 = vst.msk [vmem:[#allocation4] sm:$0xf] %vm329_vm5, %v328_v1 }
 0x219   :  { %v555_v2 = vpop.f32.mrb[4].mxu1 }
 0x21a   :  { %v556_v5 = vadd.f32 %v555_v2, %v481_v59  ;;  %v968_v6 = vpop.f32.mrb[5].mxu1 }
 0x21c   :  { %v560_v11 = vadd.f32 %v559_v3, %v556_v5 }
 0x21e   :  { %v564_v12 = vrot.slane %v560_v11, %v1306_v17 }
 0x220   :  { %565 = vst.msk [vmem:[#allocation4 + $0x4] sm:$0xf] %vm329_vm5, %v564_v12 }
 0x227   :  { %v567_v21 = vld [vmem:[#allocation4] sm:$0xff] }
 0x228   :  { %v601_v22 = vadd.f32 %v600_v20, %v567_v21 }
 0x22a   :  { %v603_v23 = vsel %vm602_vm6, %v601_v22, 0.0 }
 0x22b   :  { %v604_v24 = vrot.slane %v603_v23, 4 }
 0x22d   :  { %v605_v26 = vadd.f32 %v604_v24, %v603_v23 }
 0x22f   :  { %v606_v17 = vrot.slane %v605_v26, 2 }
 0x231   :  { %v607_v27 = vadd.f32 %v606_v17, %v605_v26 }
 0x233   :  { %v608_v28 = vrot.slane %v607_v27, 1 }
 0x235   :  { %v609_v29 = vadd.f32 %v608_v28, %v607_v27 }
 0x237   :  { %v611_v30 = vmul.f32 0.125, %v609_v29 }
 0x239   :  { %v612_v31 = vsub.f32 %v601_v22, %v611_v30 }
 0x23b   :  { %v613_v32 = vmul.f32 %v612_v31, %v612_v31 }
 0x23d   :  { %v614_v33 = vsel %vm602_vm6, %v613_v32, 0.0 }
 0x23e   :  { %v615_v34 = vrot.slane %v614_v33, 4 }
 0x240   :  { %v616_v35 = vadd.f32 %v615_v34, %v614_v33 }
 0x242   :  { %v617_v36 = vrot.slane %v616_v35, 2 }
 0x244   :  { %v618_v37 = vadd.f32 %v617_v36, %v616_v35 }
 0x246   :  { %v619_v38 = vrot.slane %v618_v37, 1 }
 0x248   :  { %v620_v39 = vadd.f32 %v619_v38, %v618_v37 }
 0x24a   :  { %v621_v40 = vmul.f32 0.125, %v620_v39 }
 0x24c   :  { %v622_v41 = vadd.f32 1e-05, %v621_v40 }
 0x24e   :  { %1037 = vrsqrt.f32 %v622_v41 }
 0x258   :  { %v1038_v42 = vpop.eup %1037 }
 0x259   :  { %v624_v44 = vmul.f32 %v1038_v42, %v612_v31 }
 0x25b   :  { %v632_v46 = vmul.f32 %v884_v43, %v624_v44 }
 0x25d   :  { %v640_v47 = vadd.f32 %v885_v45, %v632_v46 }
 0x25f   :  { %v641_v48 = vmax.f32 %v640_v47, 0.0 }
 0x261   :  { %986 = vmatmul.mubr.msk.f32.vlgmr.msra.gmra.mrb[2].mxu0 %vm602_vm6, %v641_v48 }
 0x334   :  { %v726_v49 = vpop.f32.mrb[2].mxu0 }
 0x335   :  { %v727_v50 = vadd.f32 %v886_v10, %v726_v49  ;;  %v987_v51 = vpop.f32.mrb[3].mxu0 }
 0x337   :  { %v730_v52 = vsel %vm602_vm6, %v727_v50, 0.0 }
 0x338   :  { %v731_v53 = vrot.slane %v730_v52, 4 }
 0x33a   :  { %v732_v54 = vadd.f32 %v731_v53, %v730_v52 }
 0x33c   :  { %v733_v55 = vrot.slane %v732_v54, 2 }
 0x33e   :  { %v734_v56 = vadd.f32 %v733_v55, %v732_v54 }
 0x340   :  { %v735_v57 = vrot.slane %v734_v56, 1 }
 0x342   :  { %v736_v58 = vadd.f32 %v735_v57, %v734_v56 }
 0x344   :  { %v737_v59 = vmul.f32 0.125, %v736_v58 }
 0x346   :  { %v738_v60 = vsub.f32 %v727_v50, %v737_v59 }
 0x348   :  { %v739_v61 = vmul.f32 %v738_v60, %v738_v60 }
 0x34a   :  { %v740_v62 = vsel %vm602_vm6, %v739_v61, 0.0 }
 0x34b   :  { %v741_v25 = vrot.slane %v740_v62, 4 }
 0x34d   :  { %v742_v63 = vadd.f32 %v741_v25, %v740_v62 }
 0x34f   :  { %v743_v0 = vrot.slane %v742_v63, 2 }
 0x351   :  { %v744_v1 = vadd.f32 %v743_v0, %v742_v63 }
 0x353   :  { %v745_v2 = vrot.slane %v744_v1, 1 }
 0x355   :  { %v746_v3 = vadd.f32 %v745_v2, %v744_v1 }
 0x357   :  { %v747_v4 = vmul.f32 0.125, %v746_v3 }
 0x359   :  { %v748_v5 = vadd.f32 1e-05, %v747_v4 }
 0x35b   :  { %1039 = vrsqrt.f32 %v748_v5 }
 0x365   :  { %v1040_v6 = vpop.eup %1039 }
 0x366   :  { %v750_v8 = vmul.f32 %v1040_v6, %v738_v60 }
 0x368   :  { %v758_v11 = vmul.f32 %v888_v7, %v750_v8 }
 0x36a   :  { %v766_v12 = vadd.f32 %v889_v9, %v758_v11 }
 0x36c   :  { %v767_v15 = vmax.f32 %v766_v12, 0.0 }
 0x36e   :  { %v798_v18 = vmul.f32 %v892_v13, %v767_v15  ;;  %v773_v19 = vmul.f32 %v890_v14, %v767_v15  ;;  %v823_v22 = vmul.f32 %v894_v16, %v767_v15 }
 0x370   :  { %v799_v20 = vsel %vm602_vm6, %v798_v18, 0.0  ;;  %v774_v21 = vsel %vm602_vm6, %v773_v19, 0.0  ;;  %v824_v23 = vsel %vm602_vm6, %v823_v22, 0.0 }
 0x371   :  { %800 = vadd.xlane.f32.xlu0 %v799_v20  ;;  %775 = vadd.xlane.f32.xlu1 %v774_v21 }
 0x375   :  { %825 = vadd.xlane.f32.xlu1 %v824_v23 }
 0x376   :  { %1064 = shalt.err (!%p1061_p4)
}
 0x377   :  { %s1065_s26 = scalar_lea.hbm %s1472_s19, 128 }
 0x378   :  { %p1066_p5 = scmp.ne.s32.totalorder %s1472_s19, %s1065_s26  ;;  %p1069_p6 = scmp.lt.u32.totalorder %s1065_s26, %s1472_s19 }
 0x37a   :  { %p1071_p7 = pnand %p1069_p6, %p1066_p5 }
 0x37c   :  { %1074 = shalt.err (!%p1071_p7)
}
 0x37d   :  { %852 = dma.vmem_to_hbm [thread:$0]  %s850_s16, 128, %s1472_s19, [#allocation6]  }
 0x37e   :  { %s1075_s29 = scalar_lea.vmem %s860_s7, 128  ;;  %p1080_p9 = scmp.lt.s32.totalorder %s860_s7, %s860_s7 }
 0x37f   :  { %p1076_p8 = scmp.ne.s32.totalorder %s860_s7, %s1075_s29  ;;  %p1081_p10 = scmp.lt.s32.totalorder %s1075_s29, %s1075_s29 }
 0x381   :  { %p1082_p11 = por %p1081_p10, %p1080_p9 }
 0x383   :  { %p1083_p12 = pnand %p1082_p11, %p1076_p8 }
 0x385   :  { %1086 = shalt.err (!%p1083_p12)
}
 0x386   :  { %s1087_s11 = scalar_lea.hbm %s1473_s20, 128 }
 0x387   :  { %p1088_p13 = scmp.ne.s32.totalorder %s1473_s20, %s1087_s11  ;;  %p1091_p0 = scmp.lt.u32.totalorder %s1087_s11, %s1473_s20 }
 0x389   :  { %p1093_p1 = pnand %p1091_p0, %p1088_p13 }
 0x38b   :  { %1096 = shalt.err (!%p1093_p1)
}
 0x38c   :  { %862 = dma.vmem_to_hbm [thread:$0]  %s860_s7, 128, %s1473_s20, [#allocation8]   ;;  %v893_v24 = vld [vmem:[%s1471_s18] ss:$0 sm:$0xff]  ;;  %vm791_vm7 = vcmask 7168   ;;  %vm816_vm8 = vcmask 15368  }
 0x38d   :  { %vm841_vm9 = vcmask 23568  }
 0x3fe   :  { %v801_v26 = vpop.xlane.xlu0 %800  ;;  %v776_v17 = vpop.xlane.xlu1 %775 }
 0x3ff   :  { %v809_v27 = vadd.f32 %v893_v24, %v801_v26  ;;  %v784_v28 = vadd.f32 %v893_v24, %v776_v17 }
 0x401   :  { %v810_v29 = vsub.f32 0.0, %v809_v27  ;;  %v785_v30 = vsub.f32 0.0, %v784_v28 }
 0x402   :  { %v826_v31 = vpop.xlane.xlu1 %825 }
 0x403   :  { %v811_v32 = vmul.f32 1.442695, %v810_v29  ;;  %v786_v33 = vmul.f32 1.442695, %v785_v30  ;;  %v834_v34 = vadd.f32 %v893_v24, %v826_v31 }
 0x405   :  { %1041 = vpow2.f32 %v811_v32  ;;  %v835_v35 = vsub.f32 0.0, %v834_v34 }
 0x406   :  { %1043 = vpow2.f32 %v786_v33 }
 0x407   :  { %v836_v36 = vmul.f32 1.442695, %v835_v35 }
 0x409   :  { %1045 = vpow2.f32 %v836_v36 }
 0x40f   :  { %v1042_v37 = vpop.eup %1041 }
 0x410   :  { %v1044_v38 = vpop.eup %1043  ;;  %v813_v39 = vadd.f32 1.0, %v1042_v37 }
 0x411   :  { %v788_v40 = vadd.f32 1.0, %v1044_v38 }
 0x412   :  { %1047 = vrcp.f32 %v813_v39 }
 0x413   :  { %v1046_v41 = vpop.eup %1045  ;;  %1049 = vrcp.f32 %v788_v40 }
 0x414   :  { %v838_v42 = vadd.f32 1.0, %v1046_v41 }
 0x416   :  { %1051 = vrcp.f32 %v838_v42 }
 0x41c   :  { %v1048_v43 = vpop.eup %1047 }
 0x41d   :  { %v1050_v44 = vpop.eup %1049 }
 0x41e   :  { %792 = vst.msk [vmem:[%s1474_s21] sm:$0xff] %vm791_vm7, %v1050_v44 }
 0x41f   :  { %817 = vst.msk [vmem:[%s1474_s21] sm:$0xff] %vm816_vm8, %v1048_v43 }
 0x420   :  { %v1052_v45 = vpop.eup %1051 }
 0x421   :  { %842 = vst.msk [vmem:[%s1474_s21] sm:$0xff] %vm841_vm9, %v1052_v45 }
 0x422   :  { %1097 = dma.done.wait [#allocation6], 128  }
 0x423   :  { %1098 = vsyncadd [#allocation6], 4294967168 }
 0x424   :  { %1099 = dma.done.wait [#allocation8], 128  }
 0x425   :  { %1100 = vsyncadd [#allocation8], 4294967168 }
 0x426   :  { %873 = vsyncpa [#allocation6], 1 }
 0x427   :  { %874 = vsyncpa [#allocation8], 1 }

</bundles_post_ra>
